<compile_context>
chip_gen: v6e
topology: v6e:2x2x1
jax: 0.10.0
libtpu: 0.0.40
codegen_flags: <defaults>
</compile_context>

<pallas_src>
import functools
import math

import jax
import jax.numpy as jnp
from jax.experimental import pallas as pl
from jax.experimental.pallas import tpu as pltpu


# ----------------------------------------------------------------------------
# Pallas kernels
# ----------------------------------------------------------------------------
def _linear_kernel(x_ref, w_ref, b_ref, o_ref, *, act):
    """y = act(x @ w + b);  b is (1, N) and broadcasts over rows."""
    y = jnp.dot(x_ref[...], w_ref[...], preferred_element_type=jnp.float32)
    y = y + b_ref[...]
    if act == "relu":
        y = jnp.maximum(y, 0.0)
    elif act == "tanh":
        y = jnp.tanh(y)
    o_ref[...] = y.astype(o_ref.dtype)


def _block_kernel(x0_ref, x1_ref, x2_ref, w0_ref, w1_ref, w2_ref,
                  b0_ref, b1_ref, b2_ref, o0_ref, o1_ref, o2_ref):
    """All three MultiResBlock branch ConvTranspose1d matmuls (+bias+ReLU)
    fused into a single launch."""
    def branch(x_ref, w_ref, b_ref, o_ref):
        y = jnp.dot(x_ref[...], w_ref[...], preferred_element_type=jnp.float32)
        o_ref[...] = jnp.maximum(y + b_ref[...], 0.0).astype(o_ref.dtype)

    branch(x0_ref, w0_ref, b0_ref, o0_ref)
    branch(x1_ref, w1_ref, b1_ref, o1_ref)
    branch(x2_ref, w2_ref, b2_ref, o2_ref)


def _final_kernel(x_ref, w1_ref, b1_ref, w2_ref, b2_ref, o_ref):
    """Fused final_conv: tanh(relu(x @ w1 + b1) @ w2 + b2).
    The 32-channel intermediate stays in vregs (never written to HBM)."""
    h = jnp.dot(x_ref[...], w1_ref[...], preferred_element_type=jnp.float32)
    h = jnp.maximum(h + b1_ref[...], 0.0)
    y = jnp.dot(h, w2_ref[...], preferred_element_type=jnp.float32) + b2_ref[...]
    o_ref[...] = jnp.tanh(y).astype(o_ref.dtype)


# ----------------------------------------------------------------------------
# Kernel wrappers
# ----------------------------------------------------------------------------
def fused_linear(x, w, b2, act="none", row_block=512):
    """x: (M, K), w: (K, N), b2: (1, N) -> act(x @ w + b2) in f32.

    Small M (this model: 2..64 rows): single-step grid, whole arrays as one
    block -> no per-step pipeline overhead, no padding/slicing.
    Large M: row-tiled grid marked "parallel" (megacore / v7x 2-TC sharding)."""
    M, K = x.shape
    N = w.shape[1]
    kernel = functools.partial(_linear_kernel, act=act)
    out_shape = jax.ShapeDtypeStruct((M, N), jnp.float32)

    if M <= row_block or M % 8 != 0:
        return pl.pallas_call(kernel, out_shape=out_shape)(x, w, b2)

    tm = row_block                       # power of two; stays a multiple of 8
    while M % tm != 0:
        tm //= 2
    return pl.pallas_call(
        kernel,
        out_shape=out_shape,
        grid=(M // tm,),
        in_specs=[
            pl.BlockSpec((tm, K), lambda i: (i, 0)),
            pl.BlockSpec((K, N), lambda i: (0, 0)),
            pl.BlockSpec((1, N), lambda i: (0, 0)),
        ],
        out_specs=pl.BlockSpec((tm, N), lambda i: (i, 0)),
        compiler_params=pltpu.CompilerParams(
            dimension_semantics=("parallel",)),
    )(x, w, b2)


def block_matmuls(x0, x1, x2, w0, b0, w1, b1, w2, b2):
    """One pallas_call computing the three branch matmuls of a MultiResBlock."""
    return pl.pallas_call(
        _block_kernel,
        out_shape=(
            jax.ShapeDtypeStruct((x0.shape[0], w0.shape[1]), jnp.float32),
            jax.ShapeDtypeStruct((x1.shape[0], w1.shape[1]), jnp.float32),
            jax.ShapeDtypeStruct((x2.shape[0], w2.shape[1]), jnp.float32),
        ),
    )(x0, x1, x2, w0, w1, w2, b0, b1, b2)


def final_fused(x, w1, b1, w2, b2):
    """One pallas_call for final_conv1(ReLU) -> final_conv2(Tanh)."""
    return pl.pallas_call(
        _final_kernel,
        out_shape=jax.ShapeDtypeStruct((x.shape[0], w2.shape[1]), jnp.float32),
    )(x, w1, b1, w2, b2)


# ----------------------------------------------------------------------------
# Channels-last glue ops (tiny reshuffles, no transposes, kept in XLA)
# ----------------------------------------------------------------------------
def maxpool2(x_nlc):
    # MaxPool1d(kernel_size=2, stride=2) over the length axis of (B, L, C).
    B, L, C = x_nlc.shape
    return jnp.max(x_nlc.reshape(B, L // 2, 2, C), axis=2)


def upsample2(x_nlc):
    # nn.Upsample(scale_factor=2, mode='nearest') over the length axis.
    return jnp.repeat(x_nlc, 2, axis=1)


# ----------------------------------------------------------------------------
# Parameters: synthetic init in PyTorch layout + one-time prep to kernel layout
# ----------------------------------------------------------------------------
TREE_ARCH = {3: [8, 2, 2]}   # tree_arch analogue (PyTorch snippet leaves it empty)


def init_params(key, z_dim, nlevels, feat_dims, tarch):
    """Deterministic synthetic init mirroring the PyTorch module's shapes."""
    params = {}
    base_size = int(tarch[0])

    def uinit(k, shape, fan_in):
        bound = 1.0 / math.sqrt(fan_in)
        return jax.random.uniform(k, shape, jnp.float32, -bound, bound)

    keys = jax.random.split(key, 64)
    ki = iter(range(64))

    # fc1: Linear(z_dim, base_size * feat_dims[0])  (torch (out, in) layout)
    out_f = base_size * feat_dims[0]
    params["fc1_w"] = uinit(keys[next(ki)], (out_f, z_dim), z_dim)
    params["fc1_b"] = uinit(keys[next(ki)], (out_f,), z_dim)

    # MultiResBlock1d per level 1..nlevels-1 (torch ConvTranspose1d layout (Cin, Cout, r))
    params["blocks"] = []
    for level in range(1, nlevels):
        cin = feat_dims[level - 1]
        cout = feat_dims[level]
        r = int(tarch[level])
        blk = {"up_ratio": r}
        for name, mult in (("conv0", 2), ("conv1", 3), ("conv2", 2)):
            fan_in = cin * mult * r
            blk[name + "_w"] = uinit(keys[next(ki)], (cin * mult, cout, r), fan_in)
            blk[name + "_b"] = uinit(keys[next(ki)], (cout,), fan_in)
        params["blocks"].append(blk)

    # final_conv: ConvTranspose1d(feat_dims[-1]*3, 32, 1) + ReLU,
    #             ConvTranspose1d(32, 3, 1) + Tanh
    cfin = feat_dims[-1] * 3
    params["final1_w"] = uinit(keys[next(ki)], (cfin, 32, 1), cfin)
    params["final1_b"] = uinit(keys[next(ki)], (32,), cfin)
    params["final2_w"] = uinit(keys[next(ki)], (32, 3, 1), 32)
    params["final2_b"] = uinit(keys[next(ki)], (3,), 32)
    return params


def prepare_params(params, feat_dims, base_size):
    """One-time (eager) conversion torch layout -> channels-last kernel layout.

    - fc1 columns permuted so z @ W reshapes straight to (B, L0, C0)
      (equivalent to torch's .view(B, C0, L0) followed by a transpose).
    - ConvTranspose1d(Cin, Cout, r) -> (Cin, r*Cout) with r-major / Cout-minor
      columns so (B*L, r*Cout) reshapes straight to (B, L*r, Cout); bias is
      tiled to (1, r*Cout) accordingly.
    """
    kp = {}
    C0, L0 = feat_dims[0], base_size

    w = params["fc1_w"]                                   # (C0*L0, z_dim)
    zd = w.shape[1]
    kp["fc1_w"] = (w.T.reshape(zd, C0, L0)
                       .transpose(0, 2, 1)
                       .reshape(zd, L0 * C0))             # (z_dim, L0*C0)
    kp["fc1_b"] = params["fc1_b"].reshape(C0, L0).T.reshape(1, L0 * C0)

    kp["blocks"] = []
    for blk in params["blocks"]:
        r = int(blk["up_ratio"])
        nb = {}
        for i, name in enumerate(("conv0", "conv1", "conv2")):
            wt = blk[name + "_w"]                         # (Cin*, Cout, r)
            bt = blk[name + "_b"]                         # (Cout,)
            cout = wt.shape[1]
            nb[f"w{i}"] = jnp.transpose(wt, (0, 2, 1)).reshape(wt.shape[0], r * cout)
            nb[f"b{i}"] = jnp.tile(bt, r).reshape(1, r * cout)
        kp["blocks"].append(nb)

    kp["final1_w"] = params["final1_w"].reshape(params["final1_w"].shape[0], -1)
    kp["final1_b"] = params["final1_b"].reshape(1, -1)
    kp["final2_w"] = params["final2_w"].reshape(params["final2_w"].shape[0], -1)
    kp["final2_b"] = params["final2_b"].reshape(1, -1)
    return kp


# ----------------------------------------------------------------------------
# MRTDecoder forward (channels-last everywhere)
# ----------------------------------------------------------------------------
def multires_block(blk, node, *, r, cout):
    x0, x1, x2 = node
    B = x0.shape[0]
    in0 = jnp.concatenate([x0, upsample2(x1)], axis=-1)
    in1 = jnp.concatenate([maxpool2(x0), x1, upsample2(x2)], axis=-1)
    in2 = jnp.concatenate([maxpool2(x1), x2], axis=-1)
    L0, L1, L2 = in0.shape[1], in1.shape[1], in2.shape[1]

    o0, o1, o2 = block_matmuls(
        in0.reshape(B * L0, -1), in1.reshape(B * L1, -1), in2.reshape(B * L2, -1),
        blk["w0"], blk["b0"], blk["w1"], blk["b1"], blk["w2"], blk["b2"])

    # (B*L, r*Cout) -> (B, L*r, Cout) is a free row-major reshape: the
    # ConvTranspose1d interleave is baked into the weight column order.
    return [o0.reshape(B, L0 * r, cout),
            o1.reshape(B, L1 * r, cout),
            o2.reshape(B, L2 * r, cout)]


def mrt_decoder_forward(kparams, z, *, feat_dims, tarch, base_size):
    B = z.shape[0]
    C0, L0 = feat_dims[0], base_size

    # fc1: single Pallas matmul, lane-dense N = L0*C0; result reshapes directly
    # to channels-last (B, L0, C0) thanks to the pre-permuted weights.
    node_0 = fused_linear(z, kparams["fc1_w"], kparams["fc1_b"]).reshape(B, L0, C0)
    node_1 = maxpool2(node_0)
    node_2 = maxpool2(node_1)
    node = [node_0, node_1, node_2]

    for level, blk in enumerate(kparams["blocks"], start=1):
        node = multires_block(blk, node, r=int(tarch[level]), cout=feat_dims[level])

    # concat_multires (channel axis is last)
    n0 = node[0]
    n1 = upsample2(node[1])
    n2 = upsample2(upsample2(node[2]))
    ncat = jnp.concatenate([n0, n1, n2], axis=-1)          # (B, num_points, 3*Cf)

    # fused final_conv (two 1x1 convtransposes == two dots in one kernel)
    Bc, L, Cc = ncat.shape
    out2d = final_fused(ncat.reshape(Bc * L, Cc),
                        kparams["final1_w"], kparams["final1_b"],
                        kparams["final2_w"], kparams["final2_b"])   # (B*L, 3)

    # channels-last output already equals torch's transpose(1, 2) result.
    return out2d.reshape(Bc, L, 3)


if __name__ == "__main__":
    # Small synthetic config consistent with the module's constructor.
    z_dim = 16
    nlevels = 3
    feat_dims = [32, 16, 8]
    tarch = TREE_ARCH[nlevels]
    base_size = int(tarch[0])
    num_output_points = 1
    for r in tarch:
        num_output_points *= int(r)          # = 32 for this synthetic arch
    batch = 2

    key = jax.random.PRNGKey(0)
    k_param, k_z = jax.random.split(key)
    params = init_params(k_param, z_dim, nlevels, feat_dims, tarch)
    kparams = prepare_params(params, feat_dims, base_size)   # one-time, eager
    z = jax.random.normal(k_z, (batch, z_dim), jnp.float32)

    fwd = jax.jit(functools.partial(mrt_decoder_forward,
                                    feat_dims=tuple(feat_dims),
                                    tarch=tuple(int(t) for t in tarch),
                                    base_size=base_size))
    out = fwd(kparams, z)
    out = jax.block_until_ready(out)

    assert out.shape == (batch, num_output_points, 3), out.shape
    assert out.dtype == jnp.float32
    assert bool(jnp.all(jnp.isfinite(out)))
    assert bool(jnp.all(jnp.abs(out) <= 1.0))    # tanh output range
    print("KERNEL_OK")
</pallas_src>

<mosaic_0001>
module attributes {stable_mosaic.version = 11 : i64} {
  func.func @_linear_kernel(%arg0: memref<2x16xf32, #tpu.memory_space<vmem>>, %arg1: memref<16x256xf32, #tpu.memory_space<vmem>>, %arg2: memref<1x256xf32, #tpu.memory_space<vmem>>, %arg3: memref<2x256xf32, #tpu.memory_space<vmem>>) attributes {dimension_semantics = [], scalar_prefetch = 0 : i64, scratch_operands = 0 : i64, tpu.core_type = #tpu.core_type<tc>} {
    %c0 = arith.constant 0 : index
    %c0_0 = arith.constant 0 : index
    %0 = vector.load %arg0[%c0, %c0_0] : memref<2x16xf32, #tpu.memory_space<vmem>>, vector<2x16xf32>
    %c0_1 = arith.constant 0 : index
    %c0_2 = arith.constant 0 : index
    %1 = vector.load %arg1[%c0_1, %c0_2] : memref<16x256xf32, #tpu.memory_space<vmem>>, vector<16x256xf32>
    %cst = arith.constant dense<0.000000e+00> : vector<2x256xf32>
    %2 = tpu.matmul %0, %1, %cst {dimension_numbers = #tpu.dot_dimension_numbers<[1], [0], [0], [1], [0, 0, 1, 1], [], []>} : vector<2x16xf32>, vector<16x256xf32>, vector<2x256xf32> -> vector<2x256xf32>
    %c0_3 = arith.constant 0 : index
    %c0_4 = arith.constant 0 : index
    %3 = vector.load %arg2[%c0_3, %c0_4] : memref<1x256xf32, #tpu.memory_space<vmem>>, vector<1x256xf32>
    %4 = vector.broadcast %3 : vector<1x256xf32> to vector<2x256xf32>
    %5 = arith.addf %2, %4 : vector<2x256xf32>
    %c0_5 = arith.constant 0 : index
    %c0_6 = arith.constant 0 : index
    %6 = vector.load %arg3[%c0_5, %c0_6] : memref<2x256xf32, #tpu.memory_space<vmem>>, vector<2x256xf32>
    tpu.vector_store %arg3[%c0_5, %c0_6], %5 {strides = array<i32>} : memref<2x256xf32, #tpu.memory_space<vmem>>, vector<2x256xf32>,
    return
  }
}

module attributes {stable_mosaic.version = 11 : i64} {
  func.func @_block_kernel(%arg0: memref<16x64xf32, #tpu.memory_space<vmem>>, %arg1: memref<8x96xf32, #tpu.memory_space<vmem>>, %arg2: memref<4x64xf32, #tpu.memory_space<vmem>>, %arg3: memref<64x32xf32, #tpu.memory_space<vmem>>, %arg4: memref<96x32xf32, #tpu.memory_space<vmem>>, %arg5: memref<64x32xf32, #tpu.memory_space<vmem>>, %arg6: memref<1x32xf32, #tpu.memory_space<vmem>>, %arg7: memref<1x32xf32, #tpu.memory_space<vmem>>, %arg8: memref<1x32xf32, #tpu.memory_space<vmem>>, %arg9: memref<16x32xf32, #tpu.memory_space<vmem>>, %arg10: memref<8x32xf32, #tpu.memory_space<vmem>>, %arg11: memref<4x32xf32, #tpu.memory_space<vmem>>) attributes {dimension_semantics = [], scalar_prefetch = 0 : i64, scratch_operands = 0 : i64, tpu.core_type = #tpu.core_type<tc>} {
    %c0 = arith.constant 0 : index
    %c0_0 = arith.constant 0 : index
    %0 = vector.load %arg0[%c0, %c0_0] : memref<16x64xf32, #tpu.memory_space<vmem>>, vector<16x64xf32>
    %c0_1 = arith.constant 0 : index
    %c0_2 = arith.constant 0 : index
    %1 = vector.load %arg3[%c0_1, %c0_2] : memref<64x32xf32, #tpu.memory_space<vmem>>, vector<64x32xf32>
    %cst = arith.constant dense<0.000000e+00> : vector<16x32xf32>
    %2 = tpu.matmul %0, %1, %cst {dimension_numbers = #tpu.dot_dimension_numbers<[1], [0], [0], [1], [0, 0, 1, 1], [], []>} : vector<16x64xf32>, vector<64x32xf32>, vector<16x32xf32> -> vector<16x32xf32>
    %c0_3 = arith.constant 0 : index
    %c0_4 = arith.constant 0 : index
    %3 = vector.load %arg6[%c0_3, %c0_4] : memref<1x32xf32, #tpu.memory_space<vmem>>, vector<1x32xf32>
    %4 = vector.broadcast %3 : vector<1x32xf32> to vector<16x32xf32>
    %5 = arith.addf %2, %4 : vector<16x32xf32>
    %cst_5 = arith.constant 0.000000e+00 : f32
    %6 = vector.broadcast %cst_5 : f32 to vector<16x32xf32>
    %7 = arith.maximumf %5, %6 : vector<16x32xf32>
    %c0_6 = arith.constant 0 : index
    %c0_7 = arith.constant 0 : index
    %8 = vector.load %arg9[%c0_6, %c0_7] : memref<16x32xf32, #tpu.memory_space<vmem>>, vector<16x32xf32>
    tpu.vector_store %arg9[%c0_6, %c0_7], %7 {strides = array<i32>} : memref<16x32xf32, #tpu.memory_space<vmem>>, vector<16x32xf32>,
    %c0_8 = arith.constant 0 : index
    %c0_9 = arith.constant 0 : index
    %9 = vector.load %arg1[%c0_8, %c0_9] : memref<8x96xf32, #tpu.memory_space<vmem>>, vector<8x96xf32>
    %c0_10 = arith.constant 0 : index
    %c0_11 = arith.constant 0 : index
    %10 = vector.load %arg4[%c0_10, %c0_11] : memref<96x32xf32, #tpu.memory_space<vmem>>, vector<96x32xf32>
    %cst_12 = arith.constant dense<0.000000e+00> : vector<8x32xf32>
    %11 = tpu.matmul %9, %10, %cst_12 {dimension_numbers = #tpu.dot_dimension_numbers<[1], [0], [0], [1], [0, 0, 1, 1], [], []>} : vector<8x96xf32>, vector<96x32xf32>, vector<8x32xf32> -> vector<8x32xf32>
    %c0_13 = arith.constant 0 : index
    %c0_14 = arith.constant 0 : index
    %12 = vector.load %arg7[%c0_13, %c0_14] : memref<1x32xf32, #tpu.memory_space<vmem>>, vector<1x32xf32>
    %13 = vector.broadcast %12 : vector<1x32xf32> to vector<8x32xf32>
    %14 = arith.addf %11, %13 : vector<8x32xf32>
    %cst_15 = arith.constant 0.000000e+00 : f32
    %15 = vector.broadcast %cst_15 : f32 to vector<8x32xf32>
    %16 = arith.maximumf %14, %15 : vector<8x32xf32>
    %c0_16 = arith.constant 0 : index
    %c0_17 = arith.constant 0 : index
    %17 = vector.load %arg10[%c0_16, %c0_17] : memref<8x32xf32, #tpu.memory_space<vmem>>, vector<8x32xf32>
    tpu.vector_store %arg10[%c0_16, %c0_17], %16 {strides = array<i32>} : memref<8x32xf32, #tpu.memory_space<vmem>>, vector<8x32xf32>,
    %c0_18 = arith.constant 0 : index
    %c0_19 = arith.constant 0 : index
    %18 = vector.load %arg2[%c0_18, %c0_19] : memref<4x64xf32, #tpu.memory_space<vmem>>, vector<4x64xf32>
    %c0_20 = arith.constant 0 : index
    %c0_21 = arith.constant 0 : index
    %19 = vector.load %arg5[%c0_20, %c0_21] : memref<64x32xf32, #tpu.memory_space<vmem>>, vector<64x32xf32>
    %cst_22 = arith.constant dense<0.000000e+00> : vector<4x32xf32>
    %20 = tpu.matmul %18, %19, %cst_22 {dimension_numbers = #tpu.dot_dimension_numbers<[1], [0], [0], [1], [0, 0, 1, 1], [], []>} : vector<4x64xf32>, vector<64x32xf32>, vector<4x32xf32> -> vector<4x32xf32>
    %c0_23 = arith.constant 0 : index
    %c0_24 = arith.constant 0 : index
    %21 = vector.load %arg8[%c0_23, %c0_24] : memref<1x32xf32, #tpu.memory_space<vmem>>, vector<1x32xf32>
    %22 = vector.broadcast %21 : vector<1x32xf32> to vector<4x32xf32>
    %23 = arith.addf %20, %22 : vector<4x32xf32>
    %cst_25 = arith.constant 0.000000e+00 : f32
    %24 = vector.broadcast %cst_25 : f32 to vector<4x32xf32>
    %25 = arith.maximumf %23, %24 : vector<4x32xf32>
    %c0_26 = arith.constant 0 : index
    %c0_27 = arith.constant 0 : index
    %26 = vector.load %arg11[%c0_26, %c0_27] : memref<4x32xf32, #tpu.memory_space<vmem>>, vector<4x32xf32>
    tpu.vector_store %arg11[%c0_26, %c0_27], %25 {strides = array<i32>} : memref<4x32xf32, #tpu.memory_space<vmem>>, vector<4x32xf32>,
    return
  }
}

module attributes {stable_mosaic.version = 11 : i64} {
  func.func @_block_kernel(%arg0: memref<32x32xf32, #tpu.memory_space<vmem>>, %arg1: memref<16x48xf32, #tpu.memory_space<vmem>>, %arg2: memref<8x32xf32, #tpu.memory_space<vmem>>, %arg3: memref<32x16xf32, #tpu.memory_space<vmem>>, %arg4: memref<48x16xf32, #tpu.memory_space<vmem>>, %arg5: memref<32x16xf32, #tpu.memory_space<vmem>>, %arg6: memref<1x16xf32, #tpu.memory_space<vmem>>, %arg7: memref<1x16xf32, #tpu.memory_space<vmem>>, %arg8: memref<1x16xf32, #tpu.memory_space<vmem>>, %arg9: memref<32x16xf32, #tpu.memory_space<vmem>>, %arg10: memref<16x16xf32, #tpu.memory_space<vmem>>, %arg11: memref<8x16xf32, #tpu.memory_space<vmem>>) attributes {dimension_semantics = [], scalar_prefetch = 0 : i64, scratch_operands = 0 : i64, tpu.core_type = #tpu.core_type<tc>} {
    %c0 = arith.constant 0 : index
    %c0_0 = arith.constant 0 : index
    %0 = vector.load %arg0[%c0, %c0_0] : memref<32x32xf32, #tpu.memory_space<vmem>>, vector<32x32xf32>
    %c0_1 = arith.constant 0 : index
    %c0_2 = arith.constant 0 : index
    %1 = vector.load %arg3[%c0_1, %c0_2] : memref<32x16xf32, #tpu.memory_space<vmem>>, vector<32x16xf32>
    %cst = arith.constant dense<0.000000e+00> : vector<32x16xf32>
    %2 = tpu.matmul %0, %1, %cst {dimension_numbers = #tpu.dot_dimension_numbers<[1], [0], [0], [1], [0, 0, 1, 1], [], []>} : vector<32x32xf32>, vector<32x16xf32>, vector<32x16xf32> -> vector<32x16xf32>
    %c0_3 = arith.constant 0 : index
    %c0_4 = arith.constant 0 : index
    %3 = vector.load %arg6[%c0_3, %c0_4] : memref<1x16xf32, #tpu.memory_space<vmem>>, vector<1x16xf32>
    %4 = vector.broadcast %3 : vector<1x16xf32> to vector<32x16xf32>
    %5 = arith.addf %2, %4 : vector<32x16xf32>
    %cst_5 = arith.constant 0.000000e+00 : f32
    %6 = vector.broadcast %cst_5 : f32 to vector<32x16xf32>
    %7 = arith.maximumf %5, %6 : vector<32x16xf32>
    %c0_6 = arith.constant 0 : index
    %c0_7 = arith.constant 0 : index
    %8 = vector.load %arg9[%c0_6, %c0_7] : memref<32x16xf32, #tpu.memory_space<vmem>>, vector<32x16xf32>
    tpu.vector_store %arg9[%c0_6, %c0_7], %7 {strides = array<i32>} : memref<32x16xf32, #tpu.memory_space<vmem>>, vector<32x16xf32>,
    %c0_8 = arith.constant 0 : index
    %c0_9 = arith.constant 0 : index
    %9 = vector.load %arg1[%c0_8, %c0_9] : memref<16x48xf32, #tpu.memory_space<vmem>>, vector<16x48xf32>
    %c0_10 = arith.constant 0 : index
    %c0_11 = arith.constant 0 : index
    %10 = vector.load %arg4[%c0_10, %c0_11] : memref<48x16xf32, #tpu.memory_space<vmem>>, vector<48x16xf32>
    %cst_12 = arith.constant dense<0.000000e+00> : vector<16x16xf32>
    %11 = tpu.matmul %9, %10, %cst_12 {dimension_numbers = #tpu.dot_dimension_numbers<[1], [0], [0], [1], [0, 0, 1, 1], [], []>} : vector<16x48xf32>, vector<48x16xf32>, vector<16x16xf32> -> vector<16x16xf32>
    %c0_13 = arith.constant 0 : index
    %c0_14 = arith.constant 0 : index
    %12 = vector.load %arg7[%c0_13, %c0_14] : memref<1x16xf32, #tpu.memory_space<vmem>>, vector<1x16xf32>
    %13 = vector.broadcast %12 : vector<1x16xf32> to vector<16x16xf32>
    %14 = arith.addf %11, %13 : vector<16x16xf32>
    %cst_15 = arith.constant 0.000000e+00 : f32
    %15 = vector.broadcast %cst_15 : f32 to vector<16x16xf32>
    %16 = arith.maximumf %14, %15 : vector<16x16xf32>
    %c0_16 = arith.constant 0 : index
    %c0_17 = arith.constant 0 : index
    %17 = vector.load %arg10[%c0_16, %c0_17] : memref<16x16xf32, #tpu.memory_space<vmem>>, vector<16x16xf32>
    tpu.vector_store %arg10[%c0_16, %c0_17], %16 {strides = array<i32>} : memref<16x16xf32, #tpu.memory_space<vmem>>, vector<16x16xf32>,
    %c0_18 = arith.constant 0 : index
    %c0_19 = arith.constant 0 : index
    %18 = vector.load %arg2[%c0_18, %c0_19] : memref<8x32xf32, #tpu.memory_space<vmem>>, vector<8x32xf32>
    %c0_20 = arith.constant 0 : index
    %c0_21 = arith.constant 0 : index
    %19 = vector.load %arg5[%c0_20, %c0_21] : memref<32x16xf32, #tpu.memory_space<vmem>>, vector<32x16xf32>
    %cst_22 = arith.constant dense<0.000000e+00> : vector<8x16xf32>
    %20 = tpu.matmul %18, %19, %cst_22 {dimension_numbers = #tpu.dot_dimension_numbers<[1], [0], [0], [1], [0, 0, 1, 1], [], []>} : vector<8x32xf32>, vector<32x16xf32>, vector<8x16xf32> -> vector<8x16xf32>
    %c0_23 = arith.constant 0 : index
    %c0_24 = arith.constant 0 : index
    %21 = vector.load %arg8[%c0_23, %c0_24] : memref<1x16xf32, #tpu.memory_space<vmem>>, vector<1x16xf32>
    %22 = vector.broadcast %21 : vector<1x16xf32> to vector<8x16xf32>
    %23 = arith.addf %20, %22 : vector<8x16xf32>
    %cst_25 = arith.constant 0.000000e+00 : f32
    %24 = vector.broadcast %cst_25 : f32 to vector<8x16xf32>
    %25 = arith.maximumf %23, %24 : vector<8x16xf32>
    %c0_26 = arith.constant 0 : index
    %c0_27 = arith.constant 0 : index
    %26 = vector.load %arg11[%c0_26, %c0_27] : memref<8x16xf32, #tpu.memory_space<vmem>>, vector<8x16xf32>
    tpu.vector_store %arg11[%c0_26, %c0_27], %25 {strides = array<i32>} : memref<8x16xf32, #tpu.memory_space<vmem>>, vector<8x16xf32>,
    return
  }
}

module attributes {stable_mosaic.version = 11 : i64} {
  func.func @_final_kernel(%arg0: memref<64x24xf32, #tpu.memory_space<vmem>>, %arg1: memref<24x32xf32, #tpu.memory_space<vmem>>, %arg2: memref<1x32xf32, #tpu.memory_space<vmem>>, %arg3: memref<32x3xf32, #tpu.memory_space<vmem>>, %arg4: memref<1x3xf32, #tpu.memory_space<vmem>>, %arg5: memref<64x3xf32, #tpu.memory_space<vmem>>) attributes {dimension_semantics = [], scalar_prefetch = 0 : i64, scratch_operands = 0 : i64, tpu.core_type = #tpu.core_type<tc>} {
    %c0 = arith.constant 0 : index
    %c0_0 = arith.constant 0 : index
    %0 = vector.load %arg0[%c0, %c0_0] : memref<64x24xf32, #tpu.memory_space<vmem>>, vector<64x24xf32>
    %c0_1 = arith.constant 0 : index
    %c0_2 = arith.constant 0 : index
    %1 = vector.load %arg1[%c0_1, %c0_2] : memref<24x32xf32, #tpu.memory_space<vmem>>, vector<24x32xf32>
    %cst = arith.constant dense<0.000000e+00> : vector<64x32xf32>
    %2 = tpu.matmul %0, %1, %cst {dimension_numbers = #tpu.dot_dimension_numbers<[1], [0], [0], [1], [0, 0, 1, 1], [], []>} : vector<64x24xf32>, vector<24x32xf32>, vector<64x32xf32> -> vector<64x32xf32>
    %c0_3 = arith.constant 0 : index
    %c0_4 = arith.constant 0 : index
    %3 = vector.load %arg2[%c0_3, %c0_4] : memref<1x32xf32, #tpu.memory_space<vmem>>, vector<1x32xf32>
    %4 = vector.broadcast %3 : vector<1x32xf32> to vector<64x32xf32>
    %5 = arith.addf %2, %4 : vector<64x32xf32>
    %cst_5 = arith.constant 0.000000e+00 : f32
    %6 = vector.broadcast %cst_5 : f32 to vector<64x32xf32>
    %7 = arith.maximumf %5, %6 : vector<64x32xf32>
    %c0_6 = arith.constant 0 : index
    %c0_7 = arith.constant 0 : index
    %8 = vector.load %arg3[%c0_6, %c0_7] : memref<32x3xf32, #tpu.memory_space<vmem>>, vector<32x3xf32>
    %cst_8 = arith.constant dense<0.000000e+00> : vector<64x3xf32>
    %9 = tpu.matmul %7, %8, %cst_8 {dimension_numbers = #tpu.dot_dimension_numbers<[1], [0], [0], [1], [0, 0, 1, 1], [], []>} : vector<64x32xf32>, vector<32x3xf32>, vector<64x3xf32> -> vector<64x3xf32>
    %c0_9 = arith.constant 0 : index
    %c0_10 = arith.constant 0 : index
    %10 = vector.load %arg4[%c0_9, %c0_10] : memref<1x3xf32, #tpu.memory_space<vmem>>, vector<1x3xf32>
    %11 = vector.broadcast %10 : vector<1x3xf32> to vector<64x3xf32>
    %12 = arith.addf %9, %11 : vector<64x3xf32>
    %13 = math.tanh %12 : vector<64x3xf32>
    %c0_11 = arith.constant 0 : index
    %c0_12 = arith.constant 0 : index
    %14 = vector.load %arg5[%c0_11, %c0_12] : memref<64x3xf32, #tpu.memory_space<vmem>>, vector<64x3xf32>
    tpu.vector_store %arg5[%c0_11, %c0_12], %13 {strides = array<i32>} : memref<64x3xf32, #tpu.memory_space<vmem>>, vector<64x3xf32>,
    return
  }
}

</mosaic_0001>

<bundles_post_ra>
// kernel: mrt_decoder_forward.4
= control target key start
LH: loop header
LB: loop body
LE: loop exit
PB: predicated region body
PF: predicated region fallthrough
CT: control target
= control target key end

     0   :  { %8 = vsyncpa [#allocation3], 0  ;;  %s165_s12 = smov [#allocation2]   ;;  %s201_s0 = inlined_call_operand.vmem [shape: f32[2,16], index: 0, kind: input, shape index: {}]   ;;  %s202_s1 = inlined_call_operand.hbm [shape: f32[16,256], index: 1, kind: input, shape index: {}]   ;;  %s203_s2 = inlined_call_operand.vmem [shape: f32[1,256], index: 2, kind: input, shape index: {}]   ;;  %s204_s3 = inlined_call_operand.vmem [shape: f32[2,256], index: 3, kind: output, shape index: {}]  }
   0x1   :  { %s16_s13 = sshll.u32 %s165_s12, 4  ;;  %s17_s13 = int_to_ptr.vmem [resolvable:$true] %s16_s13 }
   0x2   :  { %s151_s14 = scalar_lea.vmem %s17_s13, 512  ;;  %p156_p1 = scmp.lt.s32.totalorder %s17_s13, %s17_s13 }
   0x3   :  { %p152_p0 = scmp.ne.s32.totalorder %s17_s13, %s151_s14  ;;  %p157_p2 = scmp.lt.s32.totalorder %s151_s14, %s151_s14 }
   0x5   :  { %p158_p3 = por %p157_p2, %p156_p1 }
   0x7   :  { %p159_p4 = pnand %p158_p3, %p152_p0 }
   0x9   :  { %162 = shalt.err (!%p159_p4)
}
   0xa   :  { %s166_s15 = smov 256   ;;  %s167_s16 = smov 16  }
   0xb   :  { %22 = dma.hbm_to_vmem [thread:$0]  %s202_s1, 512, %s17_s13, [#allocation3], %s166_s15, %s166_s15, %s167_s16  }
   0xc   :  { %163 = dma.done.wait [#allocation3], 512  }
   0xd   :  { %164 = vsyncadd [#allocation3], 4294966784  ;;  %v168_v0 = vmov 0.0   ;;  %v32_v1 = vld [vmem:[#allocation2 + $0x18] sm:$0xff]  ;;  %v31_v2 = vld [vmem:[#allocation2 + $0x10] sm:$0xff]  ;;  %vm45_vm0 = vcmask 130048   ;;  %v35_v6 = vlaneseq }
   0xe   :  { %113 = vmatprep.mubr.f32.mxu0 %v168_v0  ;;  %v30_v3 = vld [vmem:[#allocation2 + $0x8] sm:$0xff]  ;;  %77 = vmatprep.subr.mxu0 %v32_v1  ;;  %v29_v4 = vld [vmem:[#allocation2] sm:$0xff] }
   0xf   :  { %78 = vmatpush1.msra.mxu0 %v31_v2  ;;  %v28_v5 = vld [vmem:[%s201_s0] sm:$0x3]  ;;  %v36_v7 = vshrl.u32 %v35_v6, 7 }
  0x10   :  { %79 = vmatprep.subr.mxu0 %v30_v3  ;;  %v33_v10 = vld [vmem:[%s203_s2] sm:$0x3] }
  0x11   :  { %80 = vmatpush1.msra.mxu0 %v29_v4  ;;  %v37_v8 = vsub.s32 0, %v36_v7  ;;  %v41_v9 = vsub.s32 1, %v36_v7 }
  0x12   :  { %137 = vmatmul.mubr.msk.f32.vlgmr.msra.gmra.mxu0 %vm45_vm0, %v28_v5 }
  0x13   :  { %v38_v11 = vrot.slane %v33_v10, %v37_v8  ;;  %v42_v12 = vrot.slane %v33_v10, %v41_v9 }
  0xd2   :  { %v115_v13 = vpop.f32.mrf.mxu0 }
  0xd3   :  { %v116_v15 = vadd.f32 %v115_v13, %v38_v11 }
  0xd4   :  { %v117_v14 = vpop.f32.mrf.mxu0 }
  0xd5   :  { %v118_v16 = vadd.f32 %v117_v14, %v42_v12 }
  0xd7   :  { %v122_v17 = vcombine.low %v116_v15, %v118_v16 }
  0xd9   :  { %138 = vst.sshfl [vmem:[%s204_s3] sm:$0x33 pattern:$0x76325410] %v122_v17 }
  0xda   :  { %136 = vsyncpa [#allocation3], 1 }

// kernel: mrt_decoder_forward.5
= control target key start
LH: loop header
LB: loop body
LE: loop exit
PB: predicated region body
PF: predicated region fallthrough
CT: control target
= control target key end

     0   :  { %v445_v2 = vmov 0.0   ;;  %vm446_vm0 = vmmov 0   ;;  %vm52_vm1 = vcmask 523264   ;;  %vm159_vm2 = vcmask 785408   ;;  %s654_s3 = inlined_call_operand.vmem [shape: f32[64,32], index: 3, kind: input, shape index: {}]   ;;  %s655_s4 = inlined_call_operand.vmem [shape: f32[96,32], index: 4, kind: input, shape index: {}]   ;;  %s656_s0 = inlined_call_operand.vmem [shape: f32[16,64], index: 0, kind: input, shape index: {}]   ;;  %s657_s5 = inlined_call_operand.vmem [shape: f32[64,32], index: 5, kind: input, shape index: {}]   ;;  %s658_s1 = inlined_call_operand.vmem [shape: f32[8,96], index: 1, kind: input, shape index: {}]   ;;  %s659_s2 = inlined_call_operand.vmem [shape: f32[4,64], index: 2, kind: input, shape index: {}]   ;;  %s660_s6 = inlined_call_operand.vmem [shape: f32[1,32], index: 6, kind: input, shape index: {}]   ;;  %s661_s9 = inlined_call_operand.vmem [shape: f32[16,32], index: 9, kind: output, shape index: {0}]   ;;  %s662_s7 = inlined_call_operand.vmem [shape: f32[1,32], index: 7, kind: input, shape index: {}]   ;;  %s663_s8 = inlined_call_operand.vmem [shape: f32[1,32], index: 8, kind: input, shape index: {}]   ;;  %s664_s10 = inlined_call_operand.vmem [shape: f32[8,32], index: 10, kind: output, shape index: {1}]   ;;  %s665_s11 = inlined_call_operand.vmem [shape: f32[4,32], index: 11, kind: output, shape index: {2}]  }
   0x1   :  { %v44_v0 = vld [vmem:[%s654_s3 + $0x38] sm:$0xff]  ;;  %v43_v1 = vld [vmem:[%s654_s3 + $0x30] sm:$0xff]  ;;  %397 = vmatprep.subr.mxu1 %v445_v2  ;;  %421 = vmatprep.mubr.msk.f32.mxu1 %vm446_vm0, %v445_v2  ;;  %v42_v4 = vld [vmem:[%s654_s3 + $0x28] sm:$0xff]  ;;  %vm136_vm3 = vcmask 261120   ;;  %vm325_vm4 = vcmask 257024  }
   0x2   :  { %378 = vmatprep.subr.mxu0 %v44_v0  ;;  %v151_v3 = vld [vmem:[%s655_s4 + $0x58] sm:$0xff]  ;;  %v150_v5 = vld [vmem:[%s655_s4 + $0x50] sm:$0xff]  ;;  %v149_v6 = vld [vmem:[%s655_s4 + $0x48] sm:$0xff] }
   0x3   :  { %379 = vmatpush3.msra.mxu0 %v44_v0  ;;  %398 = vmatpush3.msra.mxu1 %v151_v3  ;;  %v41_v7 = vld [vmem:[%s654_s3 + $0x20] sm:$0xff]  ;;  %v40_v9 = vld [vmem:[%s654_s3 + $0x18] sm:$0xff]  ;;  %v39_v11 = vld [vmem:[%s654_s3 + $0x10] sm:$0xff] }
   0x4   :  { %380 = vmatprep.subr.mxu0 %v43_v1  ;;  %399 = vmatprep.subr.mxu1 %v445_v2  ;;  %v148_v8 = vld [vmem:[%s655_s4 + $0x40] sm:$0xff]  ;;  %v147_v12 = vld [vmem:[%s655_s4 + $0x38] sm:$0xff]  ;;  %v38_v13 = vld [vmem:[%s654_s3 + $0x8] sm:$0xff] }
   0x5   :  { %381 = vmatpush3.msra.mxu0 %v43_v1  ;;  %400 = vmatpush3.msra.mxu1 %v150_v5  ;;  %v35_v10 = vld [vmem:[%s656_s0] sm:$0xff]  ;;  %v146_v14 = vld [vmem:[%s655_s4 + $0x30] sm:$0xff]  ;;  %v145_v16 = vld [vmem:[%s655_s4 + $0x28] sm:$0xff] }
   0x6   :  { %382 = vmatprep.subr.mxu0 %v42_v4  ;;  %401 = vmatprep.subr.mxu1 %v445_v2  ;;  %v37_v15 = vld [vmem:[%s654_s3] sm:$0xff]  ;;  %v36_v17 = vld [vmem:[%s656_s0 + $0x8] sm:$0xff]  ;;  %v243_v18 = vld [vmem:[%s657_s5 + $0x38] sm:$0xff] }
   0x7   :  { %383 = vmatpush3.msra.mxu0 %v42_v4  ;;  %402 = vmatpush3.msra.mxu1 %v149_v6  ;;  %v144_v19 = vld [vmem:[%s655_s4 + $0x20] sm:$0xff]  ;;  %v242_v20 = vld [vmem:[%s657_s5 + $0x30] sm:$0xff]  ;;  %v143_v21 = vld [vmem:[%s655_s4 + $0x18] sm:$0xff] }
   0x8   :  { %384 = vmatprep.subr.mxu0 %v41_v7  ;;  %403 = vmatprep.subr.mxu1 %v445_v2  ;;  %v241_v22 = vld [vmem:[%s657_s5 + $0x28] sm:$0xff]  ;;  %v142_v23 = vld [vmem:[%s655_s4 + $0x10] sm:$0xff]  ;;  %v240_v24 = vld [vmem:[%s657_s5 + $0x20] sm:$0xff] }
   0x9   :  { %385 = vmatpush3.msra.mxu0 %v41_v7  ;;  %404 = vmatpush3.msra.mxu1 %v148_v8  ;;  %v141_v25 = vld [vmem:[%s655_s4 + $0x8] sm:$0xff]  ;;  %v239_v26 = vld [vmem:[%s657_s5 + $0x18] sm:$0xff]  ;;  %v140_v27 = vld [vmem:[%s655_s4] sm:$0xff] }
   0xa   :  { %386 = vmatprep.subr.mxu0 %v40_v9  ;;  %405 = vmatprep.subr.mxu1 %v445_v2  ;;  %v139_v28 = vld [vmem:[%s658_s1] sm:$0xff]  ;;  %v238_v29 = vld [vmem:[%s657_s5 + $0x10] sm:$0xff]  ;;  %v237_v30 = vld [vmem:[%s657_s5 + $0x8] sm:$0xff] }
   0xb   :  { %387 = vmatpush3.msra.mxu0 %v40_v9  ;;  %394 = vmatprep.mubr.msk.f32.mxu0 %vm52_vm1, %v35_v10  ;;  %v236_v31 = vld [vmem:[%s657_s5] sm:$0xff] }
   0xc   :  { %388 = vmatprep.subr.mxu0 %v39_v11  ;;  %406 = vmatpush3.msra.mxu1 %v147_v12  ;;  %v235_v32 = vld [vmem:[%s659_s2] sm:$0xf] }
   0xd   :  { %389 = vmatpush3.msra.mxu0 %v39_v11  ;;  %407 = vmatprep.subr.mxu1 %v445_v2  ;;  %v339_v33 = vld [vmem:[%s660_s6] ss:$0 sm:$0xff] }
   0xe   :  { %390 = vmatprep.subr.mxu0 %v38_v13  ;;  %408 = vmatpush3.msra.mxu1 %v146_v14  ;;  %v342_v40 = vld [vmem:[%s662_s7] ss:$0 sm:$0xff] }
   0xf   :  { %391 = vmatpush3.msra.mxu0 %v38_v13  ;;  %409 = vmatprep.subr.mxu1 %v445_v2  ;;  %v344_v45 = vld [vmem:[%s663_s8] ss:$0 sm:$0xff] }
  0x10   :  { %392 = vmatprep.subr.mxu0 %v37_v15  ;;  %410 = vmatpush3.msra.mxu1 %v145_v16 }
  0x11   :  { %393 = vmatpush3.msra.mxu0 %v37_v15  ;;  %411 = vmatprep.subr.mxu1 %v445_v2 }
  0x12   :  { %395 = vmatmul.mubr.msk.f32.vlgmr.msra.gmra.mxu0 %vm52_vm1, %v36_v17  ;;  %424 = vmatprep.subr.mxu0 %v445_v2 }
  0x13   :  { %425 = vmatpush3.msra.mxu0 %v243_v18  ;;  %412 = vmatpush3.msra.mxu1 %v144_v19 }
  0x14   :  { %426 = vmatprep.subr.mxu0 %v445_v2  ;;  %413 = vmatprep.subr.mxu1 %v445_v2 }
  0x15   :  { %427 = vmatpush3.msra.mxu0 %v242_v20  ;;  %414 = vmatpush3.msra.mxu1 %v143_v21 }
  0x16   :  { %428 = vmatprep.subr.mxu0 %v445_v2  ;;  %415 = vmatprep.subr.mxu1 %v445_v2 }
  0x17   :  { %429 = vmatpush3.msra.mxu0 %v241_v22  ;;  %416 = vmatpush3.msra.mxu1 %v142_v23 }
  0x18   :  { %430 = vmatprep.subr.mxu0 %v445_v2  ;;  %417 = vmatprep.subr.mxu1 %v445_v2 }
  0x19   :  { %431 = vmatpush3.msra.mxu0 %v240_v24  ;;  %418 = vmatpush3.msra.mxu1 %v141_v25 }
  0x1a   :  { %432 = vmatprep.subr.mxu0 %v445_v2  ;;  %419 = vmatprep.subr.mxu1 %v445_v2 }
  0x1b   :  { %433 = vmatpush3.msra.mxu0 %v239_v26  ;;  %420 = vmatpush3.msra.mxu1 %v140_v27 }
  0x1c   :  { %434 = vmatprep.subr.mxu0 %v445_v2  ;;  %422 = vmatmul.mubr.msk.f32.vlgmr.msra.gmra.mxu1 %vm159_vm2, %v139_v28 }
  0x1d   :  { %435 = vmatpush3.msra.mxu0 %v238_v29  ;;  %440 = vmatprep.mubr.msk.f32.mxu0 %vm446_vm0, %v445_v2 }
  0x1e   :  { %436 = vmatprep.subr.mxu0 %v445_v2 }
  0x1f   :  { %437 = vmatpush3.msra.mxu0 %v237_v30 }
  0x20   :  { %438 = vmatprep.subr.mxu0 %v445_v2 }
  0x21   :  { %439 = vmatpush3.msra.mxu0 %v236_v31 }
  0x22   :  { %441 = vmatmul.mubr.msk.f32.vlgmr.msra.gmra.mxu0 %vm52_vm1, %v235_v32 }
  0xd2   :  { %v396_v34 = vpop.f32.mrf.mxu0 }
  0xd3   :  { %v131_v35 = vadd.f32 %v396_v34, %v339_v33 }
  0xd4   :  { %v125_v36 = vpop.f32.mrf.mxu0 }
  0xd5   :  { %v135_v37 = vmax.f32 %v131_v35, 0.0  ;;  %v126_v38 = vadd.f32 %v339_v33, %v125_v36 }
  0xd7   :  { %138 = vst.msk [vmem:[%s661_s9 + $0x8] sm:$0xff] %vm136_vm3, %v135_v37  ;;  %v134_v39 = vmax.f32 %v126_v38, 0.0 }
  0xd9   :  { %137 = vst.msk [vmem:[%s661_s9] sm:$0xff] %vm136_vm3, %v134_v39 }
  0xdc   :  { %v229_v41 = vpop.f32.mrf.mxu1 }
  0xdd   :  { %v230_v42 = vadd.f32 %v342_v40, %v229_v41 }
  0xde   :  { %v423_v43 = vpop.f32.mrf.mxu1 }
  0xdf   :  { %v233_v44 = vmax.f32 %v230_v42, 0.0 }
  0xe1   :  { %234 = vst.msk [vmem:[%s664_s10] sm:$0xff] %vm136_vm3, %v233_v44 }
  0xe2   :  { %v320_v46 = vpop.f32.mrf.mxu0 }
  0xe3   :  { %v321_v47 = vadd.f32 %v344_v45, %v320_v46 }
  0xe4   :  { %v442_v48 = vpop.f32.mrf.mxu0 }
  0xe5   :  { %v324_v49 = vmax.f32 %v321_v47, 0.0 }
  0xe7   :  { %326 = vst.msk [vmem:[%s665_s11] sm:$0xf] %vm325_vm4, %v324_v49 }

// kernel: mrt_decoder_forward.6
= control target key start
LH: loop header
LB: loop body
LE: loop exit
PB: predicated region body
PF: predicated region fallthrough
CT: control target
= control target key end

     0   :  { %vm50_vm0 = vcmask 261120   ;;  %v430_v13 = vmov 0.0   ;;  %vm172_vm1 = vcmask 392192   ;;  %vm431_vm2 = vmmov 0   ;;  %s597_s3 = inlined_call_operand.vmem [shape: f32[32,16], index: 3, kind: input, shape index: {}]   ;;  %s598_s4 = inlined_call_operand.vmem [shape: f32[48,16], index: 4, kind: input, shape index: {}]   ;;  %s599_s0 = inlined_call_operand.vmem [shape: f32[32,32], index: 0, kind: input, shape index: {}]   ;;  %s600_s5 = inlined_call_operand.vmem [shape: f32[32,16], index: 5, kind: input, shape index: {}]   ;;  %s601_s1 = inlined_call_operand.vmem [shape: f32[16,48], index: 1, kind: input, shape index: {}]   ;;  %s602_s2 = inlined_call_operand.vmem [shape: f32[8,32], index: 2, kind: input, shape index: {}]   ;;  %s603_s6 = inlined_call_operand.vmem [shape: f32[1,16], index: 6, kind: input, shape index: {}]   ;;  %s604_s9 = inlined_call_operand.vmem [shape: f32[32,16], index: 9, kind: output, shape index: {0}]   ;;  %s605_s7 = inlined_call_operand.vmem [shape: f32[1,16], index: 7, kind: input, shape index: {}]   ;;  %s606_s8 = inlined_call_operand.vmem [shape: f32[1,16], index: 8, kind: input, shape index: {}]   ;;  %s607_s10 = inlined_call_operand.vmem [shape: f32[16,16], index: 10, kind: output, shape index: {1}]   ;;  %s608_s11 = inlined_call_operand.vmem [shape: f32[8,16], index: 11, kind: output, shape index: {2}]  }
   0x1   :  { %v42_v0 = vld [vmem:[%s597_s3 + $0x18] sm:$0xff]  ;;  %v164_v1 = vld [vmem:[%s598_s4 + $0x28] sm:$0xff]  ;;  %v41_v2 = vld [vmem:[%s597_s3 + $0x10] sm:$0xff]  ;;  %vm152_vm3 = vcmask 130048  }
   0x2   :  { %388 = vmatprep.subr.mxu0 %v42_v0  ;;  %402 = vmatprep.subr.mxu1 %v164_v1  ;;  %v163_v3 = vld [vmem:[%s598_s4 + $0x20] sm:$0xff]  ;;  %v40_v4 = vld [vmem:[%s597_s3 + $0x8] sm:$0xff]  ;;  %v162_v5 = vld [vmem:[%s598_s4 + $0x18] sm:$0xff] }
   0x3   :  { %389 = vmatpush3.msra.mxu0 %v42_v0  ;;  %403 = vmatpush3.msra.mxu1 %v164_v1  ;;  %v39_v6 = vld [vmem:[%s597_s3] sm:$0xff]  ;;  %v161_v8 = vld [vmem:[%s598_s4 + $0x10] sm:$0xff]  ;;  %v36_v9 = vld [vmem:[%s599_s0 + $0x8] sm:$0xff] }
   0x4   :  { %390 = vmatprep.subr.mxu0 %v41_v2  ;;  %404 = vmatprep.subr.mxu1 %v163_v3  ;;  %v35_v7 = vld [vmem:[%s599_s0] sm:$0xff]  ;;  %v160_v10 = vld [vmem:[%s598_s4 + $0x8] sm:$0xff]  ;;  %v262_v11 = vld [vmem:[%s600_s5 + $0x18] sm:$0xff] }
   0x5   :  { %391 = vmatpush3.msra.mxu0 %v41_v2  ;;  %405 = vmatpush3.msra.mxu1 %v163_v3  ;;  %v37_v12 = vld [vmem:[%s599_s0 + $0x10] sm:$0xff]  ;;  %v159_v14 = vld [vmem:[%s598_s4] sm:$0xff]  ;;  %v38_v16 = vld [vmem:[%s599_s0 + $0x18] sm:$0xff] }
   0x6   :  { %392 = vmatprep.subr.mxu0 %v40_v4  ;;  %406 = vmatprep.subr.mxu1 %v162_v5  ;;  %v261_v15 = vld [vmem:[%s600_s5 + $0x10] sm:$0xff]  ;;  %v157_v17 = vld [vmem:[%s601_s1] sm:$0xff]  ;;  %v158_v18 = vld [vmem:[%s601_s1 + $0x8] sm:$0xff] }
   0x7   :  { %393 = vmatpush3.msra.mxu0 %v40_v4  ;;  %407 = vmatpush3.msra.mxu1 %v162_v5  ;;  %v260_v19 = vld [vmem:[%s600_s5 + $0x8] sm:$0xff]  ;;  %v259_v20 = vld [vmem:[%s600_s5] sm:$0xff] }
   0x8   :  { %394 = vmatprep.subr.mxu0 %v39_v6  ;;  %396 = vmatprep.mubr.msk.f32.mxu0 %vm50_vm0, %v35_v7  ;;  %v258_v21 = vld [vmem:[%s602_s2] sm:$0xff] }
   0x9   :  { %395 = vmatpush3.msra.mxu0 %v39_v6  ;;  %408 = vmatprep.subr.mxu1 %v161_v8  ;;  %v357_v22 = vld [vmem:[%s603_s6] ss:$0 sm:$0xff] }
   0xa   :  { %397 = vmatmul.mubr.msk.f32.vlgmr.msra.gmra.mxu0 %vm50_vm0, %v36_v9  ;;  %409 = vmatpush3.msra.mxu1 %v161_v8  ;;  %v362_v30 = vld [vmem:[%s605_s7] ss:$0 sm:$0xff] }
   0xb   :  { %417 = vmatprep.subr.mxu0 %v430_v13  ;;  %410 = vmatprep.subr.mxu1 %v160_v10  ;;  %v365_v37 = vld [vmem:[%s606_s8] ss:$0 sm:$0xff] }
   0xc   :  { %418 = vmatpush3.msra.mxu0 %v262_v11  ;;  %411 = vmatpush3.msra.mxu1 %v160_v10 }
   0xd   :  { %419 = vmatprep.subr.mxu0 %v430_v13  ;;  %399 = vmatprep.mubr.msk.f32.mxu0 %vm50_vm0, %v37_v12 }
   0xe   :  { %412 = vmatprep.subr.mxu1 %v159_v14  ;;  %420 = vmatpush3.msra.mxu0 %v261_v15 }
   0xf   :  { %400 = vmatmul.mubr.msk.f32.gmra.mxu0 %vm50_vm0, %v38_v16  ;;  %413 = vmatpush3.msra.mxu1 %v159_v14 }
  0x10   :  { %414 = vmatprep.mubr.msk.f32.mxu1 %vm172_vm1, %v157_v17  ;;  %421 = vmatprep.subr.mxu0 %v430_v13 }
  0x11   :  { %415 = vmatmul.mubr.msk.f32.vlgmr.msra.gmra.mxu1 %vm172_vm1, %v158_v18  ;;  %422 = vmatpush3.msra.mxu0 %v260_v19 }
  0x12   :  { %423 = vmatprep.subr.mxu0 %v430_v13  ;;  %425 = vmatprep.mubr.msk.f32.mxu0 %vm431_vm2, %v430_v13 }
  0x13   :  { %424 = vmatpush3.msra.mxu0 %v259_v20 }
  0x14   :  { %426 = vmatmul.mubr.msk.f32.vlgmr.msra.gmra.mxu0 %vm50_vm0, %v258_v21 }
  0xca   :  { %v398_v23 = vpop.f32.mrf.mxu0 }
  0xcb   :  { %v135_v24 = vadd.f32 %v398_v23, %v357_v22 }
  0xcc   :  { %v129_v25 = vpop.f32.mrf.mxu0 }
  0xcd   :  { %v149_v26 = vmax.f32 %v135_v24, 0.0  ;;  %v130_v27 = vadd.f32 %v357_v22, %v129_v25 }
  0xcf   :  { %154 = vst.msk [vmem:[%s604_s9 + $0x8] sm:$0xff] %vm152_vm3, %v149_v26  ;;  %v148_v28 = vmax.f32 %v130_v27, 0.0  ;;  %v401_v29 = vpop.f32.mrf.mxu0 }
  0xd0   :  { %v145_v31 = vadd.f32 %v401_v29, %v357_v22 }
  0xd1   :  { %153 = vst.msk [vmem:[%s604_s9] sm:$0xff] %vm152_vm3, %v148_v28  ;;  %v416_v32 = vpop.f32.mrf.mxu1  ;;  %v139_v33 = vpop.f32.mrf.mxu0 }
  0xd2   :  { %v151_v34 = vmax.f32 %v145_v31, 0.0  ;;  %v251_v35 = vadd.f32 %v416_v32, %v362_v30  ;;  %v140_v36 = vadd.f32 %v357_v22, %v139_v33 }
  0xd3   :  { %v245_v38 = vpop.f32.mrf.mxu1 }
  0xd4   :  { %156 = vst.msk [vmem:[%s604_s9 + $0x18] sm:$0xff] %vm152_vm3, %v151_v34  ;;  %v255_v39 = vmax.f32 %v251_v35, 0.0  ;;  %v150_v40 = vmax.f32 %v140_v36, 0.0  ;;  %v246_v41 = vadd.f32 %v362_v30, %v245_v38  ;;  %v339_v42 = vpop.f32.mrf.mxu0 }
  0xd5   :  { %v340_v43 = vadd.f32 %v365_v37, %v339_v42 }
  0xd6   :  { %257 = vst.msk [vmem:[%s607_s10 + $0x8] sm:$0xff] %vm152_vm3, %v255_v39  ;;  %155 = vst.msk [vmem:[%s604_s9 + $0x10] sm:$0xff] %vm152_vm3, %v150_v40  ;;  %v254_v44 = vmax.f32 %v246_v41, 0.0  ;;  %v427_v45 = vpop.f32.mrf.mxu0 }
  0xd7   :  { %v343_v46 = vmax.f32 %v340_v43, 0.0 }
  0xd8   :  { %256 = vst.msk [vmem:[%s607_s10] sm:$0xff] %vm152_vm3, %v254_v44 }
  0xd9   :  { %344 = vst.msk [vmem:[%s608_s11] sm:$0xff] %vm152_vm3, %v343_v46 }

// kernel: mrt_decoder_forward.7
= control target key start
LH: loop header
LB: loop body
LE: loop exit
PB: predicated region body
PF: predicated region fallthrough
CT: control target
= control target key end

     0   :  { %vm38_vm0 = vcmask 195584   ;;  %vm187_vm1 = vcmask 261120   ;;  %vm325_vm2 = vcmask 23552   ;;  %s562_s1 = inlined_call_operand.vmem [shape: f32[24,32], index: 1, kind: input, shape index: {}]   ;;  %s563_s0 = inlined_call_operand.vmem [shape: f32[64,24], index: 0, kind: input, shape index: {}]   ;;  %s564_s3 = inlined_call_operand.vmem [shape: f32[32,3], index: 3, kind: input, shape index: {}]   ;;  %s565_s2 = inlined_call_operand.vmem [shape: f32[1,32], index: 2, kind: input, shape index: {}]   ;;  %s566_s4 = inlined_call_operand.vmem [shape: f32[1,3], index: 4, kind: input, shape index: {}]   ;;  %s567_s5 = inlined_call_operand.vmem [shape: f32[64,3], index: 5, kind: output, shape index: {}]  }
   0x1   :  { %v30_v0 = vld [vmem:[%s562_s1 + $0x10] sm:$0xff]  ;;  %v29_v1 = vld [vmem:[%s562_s1 + $0x8] sm:$0xff]  ;;  %v20_v2 = vld [vmem:[%s563_s0] sm:$0xff] }
   0x2   :  { %379 = vmatprep.subr.mxu0 %v30_v0  ;;  %v28_v3 = vld [vmem:[%s562_s1] sm:$0xff]  ;;  %385 = vmatprep.mubr.msk.f32.mxu0 %vm38_vm0, %v20_v2  ;;  %v21_v4 = vld [vmem:[%s563_s0 + $0x8] sm:$0xff]  ;;  %v22_v5 = vld [vmem:[%s563_s0 + $0x10] sm:$0xff] }
   0x3   :  { %380 = vmatpush3.msra.mxu0 %v30_v0  ;;  %v23_v6 = vld [vmem:[%s563_s0 + $0x18] sm:$0xff]  ;;  %v24_v7 = vld [vmem:[%s563_s0 + $0x20] sm:$0xff]  ;;  %v25_v8 = vld [vmem:[%s563_s0 + $0x28] sm:$0xff] }
   0x4   :  { %381 = vmatprep.subr.mxu0 %v29_v1  ;;  %v26_v9 = vld [vmem:[%s563_s0 + $0x30] sm:$0xff]  ;;  %v27_v10 = vld [vmem:[%s563_s0 + $0x38] sm:$0xff]  ;;  %v177_v13 = vld [vmem:[%s564_s3 + $0x8] sm:$0xff] }
   0x5   :  { %382 = vmatpush3.msra.mxu0 %v29_v1  ;;  %v179_v11 = vld [vmem:[%s564_s3 + $0x18] sm:$0xff]  ;;  %v178_v12 = vld [vmem:[%s564_s3 + $0x10] sm:$0xff]  ;;  %v176_v14 = vld [vmem:[%s564_s3] sm:$0xff] }
   0x6   :  { %383 = vmatprep.subr.mxu0 %v28_v3  ;;  %397 = vmatprep.subr.mxu1 %v179_v11  ;;  %v338_v15 = vld [vmem:[%s565_s2] ss:$0 sm:$0xff] }
   0x7   :  { %384 = vmatpush3.msra.mxu0 %v28_v3  ;;  %398 = vmatpush3.msra.mxu1 %v179_v11  ;;  %v347_v40 = vld [vmem:[%s566_s4] ss:$0 sm:$0xff] }
   0x8   :  { %386 = vmatmul.mubr.msk.f32.vlgmr.msra.gmra.mxu0 %vm38_vm0, %v21_v4  ;;  %399 = vmatprep.subr.mxu1 %v178_v12 }
   0x9   :  { %388 = vmatprep.mubr.msk.f32.mxu0 %vm38_vm0, %v22_v5  ;;  %400 = vmatpush3.msra.mxu1 %v178_v12 }
   0xa   :  { %401 = vmatprep.subr.mxu1 %v177_v13 }
   0xb   :  { %402 = vmatpush3.msra.mxu1 %v177_v13 }
   0xc   :  { %389 = vmatmul.mubr.msk.f32.gmra.mxu0 %vm38_vm0, %v23_v6  ;;  %403 = vmatprep.subr.mxu1 %v176_v14 }
   0xd   :  { %391 = vmatprep.mubr.msk.f32.mxu0 %vm38_vm0, %v24_v7  ;;  %404 = vmatpush3.msra.mxu1 %v176_v14 }
  0x10   :  { %392 = vmatmul.mubr.msk.f32.gmra.mxu0 %vm38_vm0, %v25_v8 }
  0x11   :  { %394 = vmatprep.mubr.msk.f32.mxu0 %vm38_vm0, %v26_v9 }
  0x14   :  { %395 = vmatmul.mubr.msk.f32.gmra.mxu0 %vm38_vm0, %v27_v10 }
  0xc8   :  { %v387_v16 = vpop.f32.mrf.mxu0 }
  0xc9   :  { %v135_v17 = vadd.f32 %v387_v16, %v338_v15 }
  0xca   :  { %v129_v18 = vpop.f32.mrf.mxu0 }
  0xcb   :  { %v130_v19 = vadd.f32 %v338_v15, %v129_v18  ;;  %v169_v22 = vmax.f32 %v135_v17, 0.0 }
  0xcc   :  { %v390_v20 = vpop.f32.mrf.mxu0 }
  0xcd   :  { %v168_v21 = vmax.f32 %v130_v19, 0.0  ;;  %v145_v23 = vadd.f32 %v390_v20, %v338_v15 }
  0xce   :  { %v139_v24 = vpop.f32.mrf.mxu0 }
  0xcf   :  { %v140_v25 = vadd.f32 %v338_v15, %v139_v24  ;;  %405 = vmatprep.mubr.msk.f32.mxu1 %vm187_vm1, %v168_v21  ;;  %v171_v28 = vmax.f32 %v145_v23, 0.0 }
  0xd0   :  { %v393_v26 = vpop.f32.mrf.mxu0  ;;  %406 = vmatmul.mubr.msk.f32.vlgmr.msra.gmra.mxu1 %vm187_vm1, %v169_v22 }
  0xd1   :  { %v170_v27 = vmax.f32 %v140_v25, 0.0  ;;  %v155_v29 = vadd.f32 %v393_v26, %v338_v15 }
  0xd2   :  { %v149_v30 = vpop.f32.mrf.mxu0 }
  0xd3   :  { %v150_v31 = vadd.f32 %v338_v15, %v149_v30  ;;  %408 = vmatprep.mubr.msk.f32.mxu1 %vm187_vm1, %v170_v27  ;;  %v173_v34 = vmax.f32 %v155_v29, 0.0 }
  0xd4   :  { %v396_v32 = vpop.f32.mrf.mxu0  ;;  %409 = vmatmul.mubr.msk.f32.gmra.mxu1 %vm187_vm1, %v171_v28 }
  0xd5   :  { %v172_v33 = vmax.f32 %v150_v31, 0.0  ;;  %v165_v35 = vadd.f32 %v396_v32, %v338_v15 }
  0xd6   :  { %v159_v36 = vpop.f32.mrf.mxu0 }
  0xd7   :  { %v160_v37 = vadd.f32 %v338_v15, %v159_v36  ;;  %411 = vmatprep.mubr.msk.f32.mxu1 %vm187_vm1, %v172_v33  ;;  %v175_v39 = vmax.f32 %v165_v35, 0.0 }
  0xd8   :  { %412 = vmatmul.mubr.msk.f32.gmra.mxu1 %vm187_vm1, %v173_v34 }
  0xd9   :  { %v174_v38 = vmax.f32 %v160_v37, 0.0 }
  0xdb   :  { %414 = vmatprep.mubr.msk.f32.mxu1 %vm187_vm1, %v174_v38 }
  0xdc   :  { %415 = vmatmul.mubr.msk.f32.gmra.mxu1 %vm187_vm1, %v175_v39 }
 0x190   :  { %v407_v41 = vpop.f32.mrf.mxu1 }
 0x191   :  { %v284_v42 = vadd.f32 %v407_v41, %v347_v40 }
 0x192   :  { %v278_v43 = vpop.f32.mrf.mxu1 }
 0x193   :  { %417 = vtanh.f32 %v284_v42  ;;  %v279_v44 = vadd.f32 %v347_v40, %v278_v43 }
 0x194   :  { %v410_v45 = vpop.f32.mrf.mxu1 }
 0x195   :  { %419 = vtanh.f32 %v279_v44  ;;  %v294_v46 = vadd.f32 %v410_v45, %v347_v40 }
 0x196   :  { %v288_v47 = vpop.f32.mrf.mxu1 }
 0x197   :  { %421 = vtanh.f32 %v294_v46  ;;  %v289_v48 = vadd.f32 %v347_v40, %v288_v47 }
 0x198   :  { %v413_v49 = vpop.f32.mrf.mxu1 }
 0x199   :  { %423 = vtanh.f32 %v289_v48  ;;  %v304_v50 = vadd.f32 %v413_v49, %v347_v40 }
 0x19a   :  { %v298_v51 = vpop.f32.mrf.mxu1 }
 0x19b   :  { %425 = vtanh.f32 %v304_v50  ;;  %v299_v52 = vadd.f32 %v347_v40, %v298_v51 }
 0x19c   :  { %v416_v53 = vpop.f32.mrf.mxu1 }
 0x19d   :  { %427 = vtanh.f32 %v299_v52  ;;  %v314_v54 = vadd.f32 %v416_v53, %v347_v40 }
 0x19e   :  { %v308_v55 = vpop.f32.mrf.mxu1 }
 0x19f   :  { %429 = vtanh.f32 %v314_v54  ;;  %v309_v56 = vadd.f32 %v347_v40, %v308_v55 }
 0x1a0   :  { %v418_v57 = vpop.eup %417 }
 0x1a1   :  { %327 = vst.msk [vmem:[%s567_s5 + $0x8] sm:$0xff] %vm325_vm2, %v418_v57  ;;  %431 = vtanh.f32 %v309_v56 }
 0x1a2   :  { %v420_v58 = vpop.eup %419 }
 0x1a3   :  { %326 = vst.msk [vmem:[%s567_s5] sm:$0xff] %vm325_vm2, %v420_v58 }
 0x1a4   :  { %v422_v59 = vpop.eup %421 }
 0x1a5   :  { %329 = vst.msk [vmem:[%s567_s5 + $0x18] sm:$0xff] %vm325_vm2, %v422_v59 }
 0x1a6   :  { %v424_v60 = vpop.eup %423 }
 0x1a7   :  { %328 = vst.msk [vmem:[%s567_s5 + $0x10] sm:$0xff] %vm325_vm2, %v424_v60 }
 0x1a8   :  { %v426_v61 = vpop.eup %425 }
 0x1a9   :  { %331 = vst.msk [vmem:[%s567_s5 + $0x28] sm:$0xff] %vm325_vm2, %v426_v61 }
 0x1aa   :  { %v428_v62 = vpop.eup %427 }
 0x1ab   :  { %330 = vst.msk [vmem:[%s567_s5 + $0x20] sm:$0xff] %vm325_vm2, %v428_v62 }
 0x1ac   :  { %v430_v63 = vpop.eup %429 }
 0x1ad   :  { %333 = vst.msk [vmem:[%s567_s5 + $0x38] sm:$0xff] %vm325_vm2, %v430_v63 }
 0x1ae   :  { %v432_v0 = vpop.eup %431 }
 0x1af   :  { %332 = vst.msk [vmem:[%s567_s5 + $0x30] sm:$0xff] %vm325_vm2, %v432_v0 }

</bundles_post_ra>
